<compile_context>
chip_gen: v5e
topology: v5e:2x2
jax: 0.10.0
libtpu: 0.0.40
codegen_flags: <defaults>
</compile_context>

<pallas_src>
import jax
import jax.numpy as jnp
from jax.experimental import pallas as pl
from jax.experimental.pallas import tpu as pltpu


def _rochet_kernel(xt_ref, a_ref, w_ref, out_ref):
    # xt_ref : (num_items+1, TM)        valuations^T with a trailing row of ones
    # a_ref  : (num_menus, num_items+1) [tau*allocs | -tau*pay]
    # w_ref  : (2, num_menus)           [pay+offsets ; ones]
    # out_ref: (1, TM)                  lane-dense expected payment per instance
    #
    # One MXU matmul gives logits[m, i] = tau * (x[i]·allocs[m] - pay[m]).
    logits = jnp.dot(a_ref[...], xt_ref[...],
                     preferred_element_type=jnp.float32)            # (M, TM)

    # Numerically stable softmax over menus (sublane axis), fused with the
    # payout reduction: a single matmul with [payoff ; ones] yields numerator
    # and denominator together; `probs` is never materialized.
    m = jnp.max(logits, axis=0, keepdims=True)                      # (1, TM) XLU
    e = jnp.exp(logits - m)                                         # (M, TM) EUP
    nd = jnp.dot(w_ref[...], e, preferred_element_type=jnp.float32)  # (2, TM)
    numer = nd[0:1, :]
    denom = nd[1:2, :]

    # EUP approximate reciprocal + one Newton step (error ~ eps^2, keeps the
    # 1e-4 parity with the f32 reference while staying off the VPU divide).
    r = pl.reciprocal(denom, approx=True)
    r = r * (2.0 - denom * r)
    out_ref[...] = numer * r


def _choose_tile(n_pad):
    """n_pad is a multiple of 128.  Big tiles amortize the ~0.35us/grid-step
    overhead; keep >= 2 grid steps when possible so both v7x TensorCores get
    work (no effect on v5e/v6e)."""
    for t in (1024, 512, 256, 128):
        if n_pad % t == 0 and n_pad // t >= 2:
            return t
    return n_pad  # single grid step (small N)


def rochet_net_offsets_forward(x, allocs, offsets, pay_param, scale, null_idx,
                               tau=100.0, *, tm=None):
    """Pallas forward pass.  x: [N, num_items] -> pay: [N]."""
    num_menus, num_items = allocs.shape
    n = x.shape[0]
    f32 = jnp.float32

    # ---- parameter preprocessing (tiny, once per call) ----
    pay = pay_param.astype(f32) * scale.astype(f32)[0]   # scale actions
    pay = pay.at[null_idx].set(0.0)                      # IR: null menu pays 0
    payoff = pay + offsets.astype(f32)                   # payment of chosen menu

    # Fold tau and the pay subtraction into the matmul operand:
    #   logits = tau*(x @ allocs.T - pay) = [tau*allocs | -tau*pay] @ [x | 1]^T
    a_aug = jnp.concatenate([allocs.astype(f32) * tau, (-tau) * pay[:, None]],
                            axis=1)                                  # (M, I+1)
    # Fused numerator/denominator weights for the softmax-payout reduction.
    w2 = jnp.stack([payoff, jnp.ones((num_menus,), f32)], axis=0)    # (2, M)

    # Present x transposed (menus -> sublanes, instances -> lanes) with an
    # appended ones row so the output lands lane-dense per tile.  Kept f32 on
    # the MXU to hold 1e-4 parity with the f32 reference.
    xt_aug = jnp.concatenate([x.astype(f32), jnp.ones((n, 1), f32)],
                             axis=1).T                               # (I+1, N)

    # Pad the instance axis to a lane-aligned tile so any N is supported.
    if tm is None:
        n_pad = ((n + 127) // 128) * 128
        tm = _choose_tile(n_pad)
    n_pad = ((n + tm - 1) // tm) * tm
    if n_pad != n:
        xt_aug = jnp.pad(xt_aug, ((0, 0), (0, n_pad - n)))
    grid = n_pad // tm

    # VMEM at these sizes (TM<=1024, M=128): ~1 MiB of intermediates plus
    # double-buffered input tiles — far under even v7x's 32 MiB scoped default,
    # so no vmem_limit_bytes override is needed.  Re-budget if num_menus grows.
    out = pl.pallas_call(
        _rochet_kernel,
        out_shape=jax.ShapeDtypeStruct((1, n_pad), f32),
        grid_spec=pltpu.PrefetchScalarGridSpec(
            num_scalar_prefetch=0,
            grid=(grid,),
            in_specs=[
                pl.BlockSpec((num_items + 1, tm), lambda i: (0, i)),        # x^T tile
                pl.BlockSpec((num_menus, num_items + 1), lambda i: (0, 0)),  # A_aug
                pl.BlockSpec((2, num_menus), lambda i: (0, 0)),             # [payoff;1]
            ],
            out_specs=pl.BlockSpec((1, tm), lambda i: (0, i)),              # lane-dense
        ),
        compiler_params=pltpu.CompilerParams(
            dimension_semantics=("parallel",)),
    )(xt_aug, a_aug, w2)
    return out[0, :n]


def _reference_forward(x, allocs, offsets, pay_param, scale, null_idx, tau):
    pay = pay_param * scale[0]
    pay = pay.at[null_idx].set(0.0)
    utility = x @ allocs.T - pay[None, :]
    return jax.nn.softmax(utility * tau, axis=-1) @ (pay + offsets)


if __name__ == "__main__":
    key = jax.random.PRNGKey(0)
    k_alloc, k_off, k_pay, k_x = jax.random.split(key, 4)

    num_instances = 1024      # -> tm=512, grid=2 (both v7x TCs get a step)
    num_items = 8
    num_menus = 128
    tau = 100.0

    # Deterministic synthetic parameters / buffers (shapes per module __init__).
    allocs = jax.random.uniform(k_alloc, (num_menus, num_items), jnp.float32)
    allocs = allocs.at[0].set(0.0)                 # null (zero-allocation) menu
    null_idx = 0                                   # np.where(allocs.sum(-1)==0)[0][0]
    offsets = 0.1 * jax.random.normal(k_off, (num_menus,), jnp.float32)
    # nn.init.zeros_ would give zeros; use small deterministic values so the
    # softmax / payout path is exercised non-trivially.
    pay_param = 0.05 * jax.random.normal(k_pay, (num_menus,), jnp.float32)
    scale = jnp.array([1.0], jnp.float32)

    # Valuations x: [num_instances, num_items]
    x = jax.random.uniform(k_x, (num_instances, num_items), jnp.float32)

    out = rochet_net_offsets_forward(x, allocs, offsets, pay_param, scale,
                                     null_idx, tau=tau)
    out = jax.block_until_ready(out)

    ref = _reference_forward(x, allocs, offsets, pay_param, scale, null_idx, tau)
    assert out.shape == (num_instances,)
    assert jnp.allclose(out, ref, atol=1e-4, rtol=1e-4), (
        float(jnp.max(jnp.abs(out - ref))))

    print("KERNEL_OK")
</pallas_src>

<mosaic_0001>
module attributes {stable_mosaic.version = 11 : i64} {
  func.func @_rochet_kernel(%arg0: i32, %arg1: memref<9x512xf32, #tpu.memory_space<vmem>>, %arg2: memref<128x9xf32, #tpu.memory_space<vmem>>, %arg3: memref<2x128xf32, #tpu.memory_space<vmem>>, %arg4: memref<1x512xf32, #tpu.memory_space<vmem>>) attributes {dimension_semantics = [#tpu.dimension_semantics<parallel>], iteration_bounds = array<i64: 2>, scalar_prefetch = 0 : i64, scratch_operands = 0 : i64, tpu.core_type = #tpu.core_type<tc>, window_params = [{transform_indices = @transform_0, window_bounds = array<i64: 9, 512>}, {pipeline_mode = #tpu.pipeline_mode<synchronous>, transform_indices = @transform_1, window_bounds = array<i64: 128, 9>}, {pipeline_mode = #tpu.pipeline_mode<synchronous>, transform_indices = @transform_2, window_bounds = array<i64: 2, 128>}, {transform_indices = @transform_3, window_bounds = array<i64: 1, 512>}]} {
    %c0 = arith.constant 0 : index
    %c0_0 = arith.constant 0 : index
    %0 = vector.load %arg2[%c0, %c0_0] : memref<128x9xf32, #tpu.memory_space<vmem>>, vector<128x9xf32>
    %c0_1 = arith.constant 0 : index
    %c0_2 = arith.constant 0 : index
    %1 = vector.load %arg1[%c0_1, %c0_2] : memref<9x512xf32, #tpu.memory_space<vmem>>, vector<9x512xf32>
    %cst = arith.constant dense<0.000000e+00> : vector<128x512xf32>
    %2 = tpu.matmul %0, %1, %cst {dimension_numbers = #tpu.dot_dimension_numbers<[1], [0], [0], [1], [0, 0, 1, 1], [], []>} : vector<128x9xf32>, vector<9x512xf32>, vector<128x512xf32> -> vector<128x512xf32>
    %cst_3 = arith.constant dense<0xFF800000> : vector<512xf32>
    %3 = vector.multi_reduction <maximumf>, %2, %cst_3 [0] : vector<128x512xf32> to vector<512xf32>
    %4 = vector.shape_cast %3 : vector<512xf32> to vector<1x512xf32>
    %5 = vector.broadcast %4 : vector<1x512xf32> to vector<128x512xf32>
    %6 = arith.subf %2, %5 : vector<128x512xf32>
    %7 = math.exp %6 : vector<128x512xf32>
    %c0_4 = arith.constant 0 : index
    %c0_5 = arith.constant 0 : index
    %8 = vector.load %arg3[%c0_4, %c0_5] : memref<2x128xf32, #tpu.memory_space<vmem>>, vector<2x128xf32>
    %cst_6 = arith.constant dense<0.000000e+00> : vector<2x512xf32>
    %9 = tpu.matmul %8, %7, %cst_6 {dimension_numbers = #tpu.dot_dimension_numbers<[1], [0], [0], [1], [0, 0, 1, 1], [], []>} : vector<2x128xf32>, vector<128x512xf32>, vector<2x512xf32> -> vector<2x512xf32>
    %10 = vector.extract_strided_slice %9 {offsets = [0, 0], sizes = [1, 512], strides = [1, 1]} : vector<2x512xf32> to vector<1x512xf32>
    %11 = vector.extract_strided_slice %9 {offsets = [1, 0], sizes = [1, 512], strides = [1, 1]} : vector<2x512xf32> to vector<1x512xf32>
    %12 = tpu.reciprocal %11 {approx = true} : vector<1x512xf32> -> vector<1x512xf32>
    %13 = arith.mulf %11, %12 : vector<1x512xf32>
    %cst_7 = arith.constant 2.000000e+00 : f32
    %14 = vector.broadcast %cst_7 : f32 to vector<1x512xf32>
    %15 = arith.subf %14, %13 : vector<1x512xf32>
    %16 = arith.mulf %12, %15 : vector<1x512xf32>
    %17 = arith.mulf %10, %16 : vector<1x512xf32>
    %c0_8 = arith.constant 0 : index
    %c0_9 = arith.constant 0 : index
    %18 = vector.load %arg4[%c0_8, %c0_9] : memref<1x512xf32, #tpu.memory_space<vmem>>, vector<1x512xf32>
    tpu.vector_store %arg4[%c0_8, %c0_9], %17 {strides = array<i32>} : memref<1x512xf32, #tpu.memory_space<vmem>>, vector<1x512xf32>,
    return
  }
  func.func @transform_0(%arg0: i32) -> (i32, i32) {
    %c0_i32 = arith.constant 0 : i32
    %c0_i32_0 = arith.constant 0 : i32
    return %c0_i32, %arg0 : i32, i32
  }
  func.func @transform_1(%arg0: i32) -> (i32, i32) {
    %c0_i32 = arith.constant 0 : i32
    %c0_i32_0 = arith.constant 0 : i32
    %c0_i32_1 = arith.constant 0 : i32
    return %c0_i32, %c0_i32_0 : i32, i32
  }
  func.func @transform_2(%arg0: i32) -> (i32, i32) {
    %c0_i32 = arith.constant 0 : i32
    %c0_i32_0 = arith.constant 0 : i32
    %c0_i32_1 = arith.constant 0 : i32
    return %c0_i32, %c0_i32_0 : i32, i32
  }
  func.func @transform_3(%arg0: i32) -> (i32, i32) {
    %c0_i32 = arith.constant 0 : i32
    %c0_i32_0 = arith.constant 0 : i32
    return %c0_i32, %arg0 : i32, i32
  }
}

</mosaic_0001>

<bundles_post_ra>
// kernel: tpu_custom_call.1
= control target key start
LH: loop header
LB: loop body
LE: loop exit
PB: predicated region body
PF: predicated region fallthrough
CT: control target
= control target key end

     0   :  { %8 = vsyncpa [#allocation4], 0  ;;  %s1903_s0 = inlined_call_operand.vmem [shape: f32[9,1024], index: 0, kind: input, shape index: {}]   ;;  %s1904_s1 = inlined_call_operand.vmem [shape: f32[128,9], index: 1, kind: input, shape index: {}]   ;;  %s1905_s2 = inlined_call_operand.vmem [shape: f32[2,128], index: 2, kind: input, shape index: {}]   ;;  %s1906_s3 = inlined_call_operand.hbm [shape: f32[1,1024], index: 3, kind: output, shape index: {}]  }
   0x1   :  { %10 = vsyncpa [#allocation4 + $0x1], 0  ;;  %s1380_s12 = smov 0   ;;  %s1382_s13 = smov 0  }
   0x2   :  { %s1384_s14 = smov 0   ;;  %s1386_s15 = smov 0  }
   0x3 LB: > { %s1038_s16 = sadd.s32 4294967295, %s1358_s15   ;;  %s1039_s17 = sadd.s32 4294967294, %s1358_s15   ;;  %s1358_s15 = sphi %s1386_s15, %s1978_s15   ;;  %s1354_s14 = sphi %s1384_s14, %s1977_s14   ;;  %s1350_s13 = sphi %s1382_s13, %s1976_s13   ;;  %s1346_s12 = sphi %s1380_s12, %s1975_s12  }
   0x4   : > { %s1403_s18 = sadd.s32 1, %s1358_s15   ;;  %s23_s19 = sadd.s32 1, %s1354_s14 }
   0x5   : > { %s20_s20 = ssub.s32 %s1358_s15, %s1403_s18  ;;  %p30_p0 = scmp.ne.s32.totalorder %s1354_s14, %s1350_s13 }
   0x6   : > { %p21_p1 = scmp.eq.s32.totalorder %s20_s20, 0  ;;  %p31_p2 = scmp.eq.s32.totalorder %s1358_s15, 0 }
   0x7   : > { %p102_p3 = scmp.eq.s32.totalorder %s1038_s16, 1  ;;  %p107_p4 = scmp.ne.s32.totalorder %s1350_s13, %s1346_s12 }
   0x8   : > { %s1416_s21 = scalar_select %p21_p1, %s1354_s14, %s23_s19  }
   0x9   : > { %p32_p5 = por %p31_p2, %p30_p0  ;;  %p1418_p6 = por %p102_p3, %p30_p0 }
   0xa   : > { %p108_p7 = scmp.eq.s32.totalorder %s1039_s17, 1  ;;  %p1041_p9 = scmp.ge.s32.totalorder %s1358_s15, 2 }
   0xc   : > { %p1422_p8 = por %p108_p7, %p107_p4  ;;  %130 = sbr.rel (%p1041_p9) target bundleno = 29 (0x1d), region = 24 }
  0x11   : > { %133 = sbr.rel (!%p32_p5) target bundleno = 29 (0x1d), region = 28  ;;  %s135_s24 = sand.u32 (%p32_p5), 1, %s1354_s14  }
  0x12   : > { %s1120_s25 = sshll.u32 (%p32_p5), %s1358_s15, 5  ;;  %s1042_s26 = sshll.u32 (%p32_p5), %s135_s24, 6 }
  0x13   : > { %s140_s29 = scalar_lea.vmem (%p32_p5), %s1903_s0, %s1120_s25  ;;  %s137_s30 = scalar_lea.vmem (%p32_p5), [#allocation2], %s1042_s26 }
  0x14   : > { %v153_v0 = vld [vmem:[%s140_s29] sm:$0xff] (%p32_p5)  ;;  %v155_v1 = vld [vmem:[%s140_s29 + $0x8] sm:$0xff] (%p32_p5)  ;;  %v157_v2 = vld [vmem:[%s140_s29 + $0x10] sm:$0xff] (%p32_p5) }
  0x15   : > { %154 = vst [vmem:[%s137_s30] sm:$0xff] (%p32_p5), %v153_v0  ;;  %v159_v3 = vld [vmem:[%s140_s29 + $0x18] sm:$0xff] (%p32_p5)  ;;  %v161_v4 = vld [vmem:[%s140_s29 + $0x40] sm:$0xff] (%p32_p5)  ;;  %v163_v5 = vld [vmem:[%s140_s29 + $0x48] sm:$0xff] (%p32_p5) }
  0x16   : > { %156 = vst [vmem:[%s137_s30 + $0x8] sm:$0xff] %v155_v1  ;;  %v165_v6 = vld [vmem:[%s140_s29 + $0x50] sm:$0xff]  ;;  %v167_v7 = vld [vmem:[%s140_s29 + $0x58] sm:$0xff] }
  0x17   : > { %158 = vst [vmem:[%s137_s30 + $0x10] sm:$0xff] %v157_v2 }
  0x18   : > { %160 = vst [vmem:[%s137_s30 + $0x18] sm:$0xff] %v159_v3 }
  0x19   : > { %162 = vst [vmem:[%s137_s30 + $0x20] sm:$0xff] %v161_v4 }
  0x1a   : > { %164 = vst [vmem:[%s137_s30 + $0x28] sm:$0xff] %v163_v5 }
  0x1b   : > { %166 = vst [vmem:[%s137_s30 + $0x30] sm:$0xff] %v165_v6 }
  0x1c   : > { %168 = vst [vmem:[%s137_s30 + $0x38] sm:$0xff] %v167_v7 }
  0x1d PF: > { %p1045_p10 = scmp.ge.s32.totalorder %s1358_s15, 1  ;;  %p173_p11 = scmp.lt.s32.totalorder %s1358_s15, 3 }
  0x1f   : > { %p174_p12 = pnand %p1045_p10, %p173_p11 }
  0x21   : > { %177 = sbr.rel (%p174_p12) target bundleno = 537 (0x219), region = 51 }
  0x26   : > { %s1437_s4 = sand.u32 1, %s1350_s13   ;;  %vm278_vm0 = vcmask 1040384   ;;  %v205_v16 = vld [vmem:[%s1904_s1] sm:$0xff]  ;;  %vm229_vm1 = vcmask 72704   ;;  %v206_v17 = vld [vmem:[%s1904_s1 + $0x8] sm:$0xff]  ;;  %v207_v18 = vld [vmem:[%s1904_s1 + $0x10] sm:$0xff] }
  0x27   : > { %s1046_s5 = sshll.u32 %s1437_s4, 6  ;;  %v208_v19 = vld [vmem:[%s1904_s1 + $0x18] sm:$0xff]  ;;  %v209_v20 = vld [vmem:[%s1904_s1 + $0x20] sm:$0xff]  ;;  %v210_v21 = vld [vmem:[%s1904_s1 + $0x28] sm:$0xff]  ;;  %s1047_s7 = sshll.u32 %s1437_s4, 2  ;;  %vm948_vm2 = vcmask 1042434  }
  0x28   : > { %s182_s6 = scalar_lea.vmem [#allocation2], %s1046_s5  ;;  %v211_v22 = vld [vmem:[%s1904_s1 + $0x30] sm:$0xff]  ;;  %v212_v23 = vld [vmem:[%s1904_s1 + $0x38] sm:$0xff]  ;;  %v213_v24 = vld [vmem:[%s1904_s1 + $0x40] sm:$0xff]  ;;  %s1117_s8 = sshll.u32 %s1038_s16, 2  ;;  %vm950_vm3 = vcmask 1041408  }
  0x29   : > { %v225_v8 = vld [vmem:[%s182_s6 + $0x20] sm:$0x1]  ;;  %v226_v9 = vld [vmem:[%s182_s6 + $0x28] sm:$0x1]  ;;  %v227_v10 = vld [vmem:[%s182_s6 + $0x30] sm:$0x1]  ;;  %s969_s11 = scalar_lea.hbm %s1906_s3, %s1117_s8 }
  0x2a   : > { %1048 = vmatpush.msk.msra.mxu0 %vm278_vm0, %v225_v8  ;;  %1065 = vmatpush.msk.msra.mxu1 %vm278_vm0, %v226_v9  ;;  %v228_v11 = vld [vmem:[%s182_s6 + $0x38] sm:$0x1]  ;;  %v221_v12 = vld [vmem:[%s182_s6] sm:$0xff]  ;;  %v222_v13 = vld [vmem:[%s182_s6 + $0x8] sm:$0xff]  ;;  %s202_s17 = scalar_lea.vmem [#allocation3], %s1047_s7  ;;  %s973_s20 = sshll.u32 %s969_s11, 4  ;;  %s974_s20 = int_to_ptr.hbm [resolvable:$true] %s973_s20 }
  0x2b   : > { %1082 = vmatpush.msk.msra.mxu2 %vm278_vm0, %v227_v10  ;;  %1099 = vmatpush.msk.msra.mxu3 %vm278_vm0, %v228_v11  ;;  %v223_v14 = vld [vmem:[%s182_s6 + $0x10] sm:$0xff]  ;;  %v224_v15 = vld [vmem:[%s182_s6 + $0x18] sm:$0xff]  ;;  %v214_v25 = vld [vmem:[%s1904_s1 + $0x48] sm:$0xff]  ;;  %s971_s19 = sshll.u32 %s202_s17, 4  ;;  %s959_s16 = scalar_lea.sflag [#allocation4], %s1437_s4  ;;  %s972_s19 = int_to_ptr.vmem [resolvable:$true] %s971_s19 }
  0x2c   : > { %306 = vmatpush.msra.mxu0 %v221_v12  ;;  %371 = vmatpush.msra.mxu1 %v222_v13  ;;  %v215_v26 = vld [vmem:[%s1904_s1 + $0x50] sm:$0xff]  ;;  %v216_v27 = vld [vmem:[%s1904_s1 + $0x58] sm:$0xff]  ;;  %v217_v28 = vld [vmem:[%s1904_s1 + $0x60] sm:$0xff]  ;;  %s1310_s24 = sshra.s32 %s974_s20, 4  ;;  %s1316_s28 = scalar_lea.hbm %s1906_s3, 8  ;;  %s1311_s24 = int_to_ptr.hbm [resolvable:$true] %s1310_s24 }
  0x2d   : > { %436 = vmatpush.msra.mxu2 %v223_v14  ;;  %501 = vmatpush.msra.mxu3 %v224_v15  ;;  %v218_v29 = vld [vmem:[%s1904_s1 + $0x68] sm:$0xff]  ;;  %v219_v30 = vld [vmem:[%s1904_s1 + $0x70] sm:$0xff]  ;;  %v220_v31 = vld [vmem:[%s1904_s1 + $0x78] sm:$0xff]  ;;  %s1312_s25 = scalar_lea.hbm %s1311_s24, 4  ;;  %p1317_p2 = scmp.lt.s32.totalorder %s1311_s24, %s1906_s3 }
  0x2e   : > { %1049 = vmatmul.msk.f32.vlgmr.msra.gmra.mxu0 %vm229_vm1, %v205_v16  ;;  %1066 = vmatmul.msk.f32.vlgmr.msra.gmra.mxu1 %vm229_vm1, %v205_v16  ;;  %p1313_p13 = scmp.ne.s32.totalorder %s1311_s24, %s1312_s25  ;;  %p1318_p3 = scmp.lt.s32.totalorder %s1316_s28, %s1312_s25 }
  0x2f   : > { %1083 = vmatmul.msk.f32.vlgmr.msra.gmra.mxu2 %vm229_vm1, %v205_v16  ;;  %1100 = vmatmul.msk.f32.vlgmr.msra.gmra.mxu3 %vm229_vm1, %v205_v16 }
  0x30   : > { %p1314_p0 = pnand %p1313_p13, %p1418_p6  ;;  %p1319_p4 = por %p1318_p3, %p1317_p2 }
  0x32   : > { %p1315_p1 = pneg %p1314_p0 }
  0x34   : > { %p1320_p5 = pnand %p1319_p4, %p1315_p1 }
  0x36   : > { %1050 = vmatmul.msk.f32.gmra.mxu0 %vm229_vm1, %v206_v17  ;;  %1067 = vmatmul.msk.f32.gmra.mxu1 %vm229_vm1, %v206_v17 }
  0x37   : > { %1084 = vmatmul.msk.f32.gmra.mxu2 %vm229_vm1, %v206_v17  ;;  %1101 = vmatmul.msk.f32.gmra.mxu3 %vm229_vm1, %v206_v17 }
  0x3e   : > { %1051 = vmatmul.msk.f32.gmra.mxu0 %vm229_vm1, %v207_v18  ;;  %1068 = vmatmul.msk.f32.gmra.mxu1 %vm229_vm1, %v207_v18 }
  0x3f   : > { %1085 = vmatmul.msk.f32.gmra.mxu2 %vm229_vm1, %v207_v18  ;;  %1102 = vmatmul.msk.f32.gmra.mxu3 %vm229_vm1, %v207_v18 }
  0x46   : > { %1052 = vmatmul.msk.f32.gmra.mxu0 %vm229_vm1, %v208_v19  ;;  %1069 = vmatmul.msk.f32.gmra.mxu1 %vm229_vm1, %v208_v19 }
  0x47   : > { %1086 = vmatmul.msk.f32.gmra.mxu2 %vm229_vm1, %v208_v19  ;;  %1103 = vmatmul.msk.f32.gmra.mxu3 %vm229_vm1, %v208_v19 }
  0x4e   : > { %1053 = vmatmul.msk.f32.gmra.mxu0 %vm229_vm1, %v209_v20  ;;  %1070 = vmatmul.msk.f32.gmra.mxu1 %vm229_vm1, %v209_v20 }
  0x4f   : > { %1087 = vmatmul.msk.f32.gmra.mxu2 %vm229_vm1, %v209_v20  ;;  %1104 = vmatmul.msk.f32.gmra.mxu3 %vm229_vm1, %v209_v20 }
  0x56   : > { %1054 = vmatmul.msk.f32.gmra.mxu0 %vm229_vm1, %v210_v21  ;;  %1071 = vmatmul.msk.f32.gmra.mxu1 %vm229_vm1, %v210_v21 }
  0x57   : > { %1088 = vmatmul.msk.f32.gmra.mxu2 %vm229_vm1, %v210_v21  ;;  %1105 = vmatmul.msk.f32.gmra.mxu3 %vm229_vm1, %v210_v21 }
  0x5e   : > { %1055 = vmatmul.msk.f32.gmra.mxu0 %vm229_vm1, %v211_v22  ;;  %1072 = vmatmul.msk.f32.gmra.mxu1 %vm229_vm1, %v211_v22 }
  0x5f   : > { %1089 = vmatmul.msk.f32.gmra.mxu2 %vm229_vm1, %v211_v22  ;;  %1106 = vmatmul.msk.f32.gmra.mxu3 %vm229_vm1, %v211_v22 }
  0x66   : > { %1056 = vmatmul.msk.f32.gmra.mxu0 %vm229_vm1, %v212_v23  ;;  %1073 = vmatmul.msk.f32.gmra.mxu1 %vm229_vm1, %v212_v23 }
  0x67   : > { %1090 = vmatmul.msk.f32.gmra.mxu2 %vm229_vm1, %v212_v23  ;;  %1107 = vmatmul.msk.f32.gmra.mxu3 %vm229_vm1, %v212_v23 }
  0x6e   : > { %1057 = vmatmul.msk.f32.gmra.mxu0 %vm229_vm1, %v213_v24  ;;  %1074 = vmatmul.msk.f32.gmra.mxu1 %vm229_vm1, %v213_v24 }
  0x6f   : > { %1091 = vmatmul.msk.f32.gmra.mxu2 %vm229_vm1, %v213_v24  ;;  %1108 = vmatmul.msk.f32.gmra.mxu3 %vm229_vm1, %v213_v24 }
  0x76   : > { %1058 = vmatmul.msk.f32.gmra.mxu0 %vm229_vm1, %v214_v25  ;;  %1075 = vmatmul.msk.f32.gmra.mxu1 %vm229_vm1, %v214_v25 }
  0x77   : > { %1092 = vmatmul.msk.f32.gmra.mxu2 %vm229_vm1, %v214_v25  ;;  %1109 = vmatmul.msk.f32.gmra.mxu3 %vm229_vm1, %v214_v25 }
  0x7e   : > { %1059 = vmatmul.msk.f32.gmra.mxu0 %vm229_vm1, %v215_v26  ;;  %1076 = vmatmul.msk.f32.gmra.mxu1 %vm229_vm1, %v215_v26 }
  0x7f   : > { %1093 = vmatmul.msk.f32.gmra.mxu2 %vm229_vm1, %v215_v26  ;;  %1110 = vmatmul.msk.f32.gmra.mxu3 %vm229_vm1, %v215_v26 }
  0x86   : > { %1060 = vmatmul.msk.f32.gmra.mxu0 %vm229_vm1, %v216_v27  ;;  %1077 = vmatmul.msk.f32.gmra.mxu1 %vm229_vm1, %v216_v27 }
  0x87   : > { %1094 = vmatmul.msk.f32.gmra.mxu2 %vm229_vm1, %v216_v27  ;;  %1111 = vmatmul.msk.f32.gmra.mxu3 %vm229_vm1, %v216_v27 }
  0x8e   : > { %1061 = vmatmul.msk.f32.gmra.mxu0 %vm229_vm1, %v217_v28  ;;  %1078 = vmatmul.msk.f32.gmra.mxu1 %vm229_vm1, %v217_v28 }
  0x8f   : > { %1095 = vmatmul.msk.f32.gmra.mxu2 %vm229_vm1, %v217_v28  ;;  %1112 = vmatmul.msk.f32.gmra.mxu3 %vm229_vm1, %v217_v28 }
  0x96   : > { %1062 = vmatmul.msk.f32.gmra.mxu0 %vm229_vm1, %v218_v29  ;;  %1079 = vmatmul.msk.f32.gmra.mxu1 %vm229_vm1, %v218_v29 }
  0x97   : > { %1096 = vmatmul.msk.f32.gmra.mxu2 %vm229_vm1, %v218_v29  ;;  %1113 = vmatmul.msk.f32.gmra.mxu3 %vm229_vm1, %v218_v29 }
  0x9e   : > { %1063 = vmatmul.msk.f32.gmra.mxu0 %vm229_vm1, %v219_v30  ;;  %1080 = vmatmul.msk.f32.gmra.mxu1 %vm229_vm1, %v219_v30 }
  0x9f   : > { %1097 = vmatmul.msk.f32.gmra.mxu2 %vm229_vm1, %v219_v30  ;;  %1114 = vmatmul.msk.f32.gmra.mxu3 %vm229_vm1, %v219_v30 }
  0xa6   : > { %1064 = vmatmul.msk.f32.gmra.mxu0 %vm229_vm1, %v220_v31  ;;  %1081 = vmatmul.msk.f32.gmra.mxu1 %vm229_vm1, %v220_v31 }
  0xa7   : > { %1098 = vmatmul.msk.f32.gmra.mxu2 %vm229_vm1, %v220_v31  ;;  %1115 = vmatmul.msk.f32.gmra.mxu3 %vm229_vm1, %v220_v31 }
  0xab   : > { %v1556_v32 = vpop.f32.mrf.mxu0  ;;  %v1558_v33 = vpop.f32.mrf.mxu1 }
  0xac   : > { %1931 = vst [vmem:[#allocation6_spill] sm:$0xff] %v1556_v32 }
  0xad   : > { %1932 = vst [vmem:[#allocation7_spill] sm:$0xff] %v1558_v33 }
  0xb2   : > { %v1560_v34 = vpop.f32.mrf.mxu2  ;;  %v1562_v35 = vpop.f32.mrf.mxu3 }
  0xb3   : > { %1933 = vst [vmem:[#allocation8_spill] sm:$0xff] %v1560_v34  ;;  %v1564_v36 = vpop.f32.mrf.mxu0  ;;  %v1566_v37 = vpop.f32.mrf.mxu1 }
  0xb4   : > { %1934 = vst [vmem:[#allocation9_spill] sm:$0xff] %v1562_v35  ;;  %v551_v14 = vmax.f32 %v1556_v32, %v1564_v36  ;;  %v572_v15 = vmax.f32 %v1558_v33, %v1566_v37 }
  0xb5   : > { %1935 = vst [vmem:[#allocation10_spill] sm:$0xff] %v1564_v36 }
  0xb6   : > { %1936 = vst [vmem:[#allocation11_spill] sm:$0xff] %v1566_v37 }
  0xba   : > { %v1568_v38 = vpop.f32.mrf.mxu2  ;;  %v1570_v39 = vpop.f32.mrf.mxu3 }
  0xbb   : > { %1937 = vst [vmem:[#allocation12_spill] sm:$0xff] %v1568_v38  ;;  %v1572_v40 = vpop.f32.mrf.mxu0  ;;  %v1574_v41 = vpop.f32.mrf.mxu1  ;;  %v593_v26 = vmax.f32 %v1560_v34, %v1568_v38  ;;  %v614_v27 = vmax.f32 %v1562_v35, %v1570_v39 }
  0xbc   : > { %1938 = vst [vmem:[#allocation13_spill] sm:$0xff] %v1570_v39  ;;  %v552_v16 = vmax.f32 %v551_v14, %v1572_v40  ;;  %v573_v17 = vmax.f32 %v572_v15, %v1574_v41 }
  0xbd   : > { %1939 = vst [vmem:[#allocation14_spill] sm:$0xff] %v1572_v40 }
  0xbe   : > { %1940 = vst [vmem:[#allocation15_spill] sm:$0xff] %v1574_v41 }
  0xc2   : > { %v1576_v42 = vpop.f32.mrf.mxu2  ;;  %v1578_v43 = vpop.f32.mrf.mxu3 }
  0xc3   : > { %1941 = vst [vmem:[#allocation16_spill] sm:$0xff] %v1576_v42  ;;  %v1580_v44 = vpop.f32.mrf.mxu0  ;;  %v1582_v45 = vpop.f32.mrf.mxu1  ;;  %v594_v30 = vmax.f32 %v593_v26, %v1576_v42  ;;  %v615_v31 = vmax.f32 %v614_v27, %v1578_v43 }
  0xc4   : > { %1942 = vst [vmem:[#allocation17_spill] sm:$0xff] %v1578_v43  ;;  %v553_v22 = vmax.f32 %v552_v16, %v1580_v44  ;;  %v574_v23 = vmax.f32 %v573_v17, %v1582_v45 }
  0xc5   : > { %1943 = vst [vmem:[#allocation18_spill] sm:$0xff] %v1580_v44 }
  0xc6   : > { %1944 = vst [vmem:[#allocation19_spill] sm:$0xff] %v1582_v45 }
  0xca   : > { %v1584_v46 = vpop.f32.mrf.mxu2  ;;  %v1586_v47 = vpop.f32.mrf.mxu3 }
  0xcb   : > { %1945 = vst [vmem:[#allocation20_spill] sm:$0xff] %v1584_v46  ;;  %v1588_v48 = vpop.f32.mrf.mxu0  ;;  %v1590_v49 = vpop.f32.mrf.mxu1 }
  0xcc   : > { %1946 = vst [vmem:[#allocation21_spill] sm:$0xff] %v1586_v47  ;;  %v554_v24 = vmax.f32 %v553_v22, %v1588_v48  ;;  %v575_v25 = vmax.f32 %v574_v23, %v1590_v49  ;;  %v595_v22 = vmax.f32 %v594_v30, %v1584_v46  ;;  %v616_v23 = vmax.f32 %v615_v31, %v1586_v47 }
  0xd2   : > { %v1592_v50 = vpop.f32.mrf.mxu2  ;;  %v1594_v51 = vpop.f32.mrf.mxu3 }
  0xd3   : > { %1947 = vst [vmem:[#allocation22_spill] sm:$0xff] %v1592_v50  ;;  %v1596_v52 = vpop.f32.mrf.mxu0  ;;  %v1598_v53 = vpop.f32.mrf.mxu1  ;;  %v596_v27 = vmax.f32 %v595_v22, %v1592_v50 }
  0xd4   : > { %1948 = vst [vmem:[#allocation23_spill] sm:$0xff] %v1594_v51  ;;  %v555_v28 = vmax.f32 %v554_v24, %v1596_v52  ;;  %v576_v29 = vmax.f32 %v575_v25, %v1598_v53 }
  0xda   : > { %v1600_v54 = vpop.f32.mrf.mxu2  ;;  %v1602_v55 = vpop.f32.mrf.mxu3 }
  0xdb   : > { %1949 = vst [vmem:[#allocation24_spill] sm:$0xff] %v1600_v54  ;;  %v1604_v56 = vpop.f32.mrf.mxu0  ;;  %v1606_v57 = vpop.f32.mrf.mxu1  ;;  %v597_v30 = vmax.f32 %v596_v27, %v1600_v54 }
  0xdc   : > { %1950 = vst [vmem:[#allocation25_spill] sm:$0xff] %v1602_v55  ;;  %v556_v14 = vmax.f32 %v555_v28, %v1604_v56  ;;  %v577_v15 = vmax.f32 %v576_v29, %v1606_v57  ;;  %v617_v28 = vmax.f32 %v616_v23, %v1594_v51 }
  0xde   : > { %v618_v31 = vmax.f32 %v617_v28, %v1602_v55 }
  0xe2   : > { %v1608_v58 = vpop.f32.mrf.mxu2  ;;  %v1610_v59 = vpop.f32.mrf.mxu3 }
  0xe3   : > { %1951 = vst [vmem:[#allocation26_spill] sm:$0xff] %v1608_v58  ;;  %v1612_v60 = vpop.f32.mrf.mxu0  ;;  %v1614_v61 = vpop.f32.mrf.mxu1 }
  0xe4   : > { %1952 = vst [vmem:[#allocation27_spill] sm:$0xff] %v1610_v59  ;;  %v557_v25 = vmax.f32 %v556_v14, %v1612_v60  ;;  %v578_v26 = vmax.f32 %v577_v15, %v1614_v61  ;;  %v598_v14 = vmax.f32 %v597_v30, %v1608_v58  ;;  %v619_v15 = vmax.f32 %v618_v31, %v1610_v59 }
  0xea   : > { %v1616_v62 = vpop.f32.mrf.mxu2  ;;  %v1618_v63 = vpop.f32.mrf.mxu3 }
  0xeb   : > { %v1620_v0 = vpop.f32.mrf.mxu0  ;;  %v1622_v1 = vpop.f32.mrf.mxu1  ;;  %v620_v27 = vmax.f32 %v619_v15, %v1618_v63 }
  0xec   : > { %v558_v29 = vmax.f32 %v557_v25, %v1620_v0  ;;  %v579_v34 = vmax.f32 %v578_v26, %v1622_v1  ;;  %v599_v26 = vmax.f32 %v598_v14, %v1616_v62 }
  0xf2   : > { %v1624_v2 = vpop.f32.mrf.mxu2  ;;  %v1626_v3 = vpop.f32.mrf.mxu3 }
  0xf3   : > { %v1628_v4 = vpop.f32.mrf.mxu0  ;;  %v1630_v5 = vpop.f32.mrf.mxu1  ;;  %v600_v31 = vmax.f32 %v599_v26, %v1624_v2 }
  0xf4   : > { %v559_v39 = vmax.f32 %v558_v29, %v1628_v4  ;;  %v580_v38 = vmax.f32 %v579_v34, %v1630_v5 }
  0xfa   : > { %v1632_v6 = vpop.f32.mrf.mxu2  ;;  %v1634_v7 = vpop.f32.mrf.mxu3 }
  0xfb   : > { %v1636_v8 = vpop.f32.mrf.mxu0  ;;  %v1638_v9 = vpop.f32.mrf.mxu1  ;;  %v601_v47 = vmax.f32 %v600_v31, %v1632_v6 }
  0xfc   : > { %v560_v22 = vmax.f32 %v559_v39, %v1636_v8  ;;  %v581_v23 = vmax.f32 %v580_v38, %v1638_v9  ;;  %v621_v39 = vmax.f32 %v620_v27, %v1626_v3 }
  0xfe   : > { %v622_v14 = vmax.f32 %v621_v39, %v1634_v7 }
 0x102   : > { %v1640_v10 = vpop.f32.mrf.mxu2  ;;  %v1642_v11 = vpop.f32.mrf.mxu3 }
 0x103   : > { %v1644_v12 = vpop.f32.mrf.mxu0  ;;  %v1646_v13 = vpop.f32.mrf.mxu1 }
 0x104   : > { %v561_v34 = vmax.f32 %v560_v22, %v1644_v12  ;;  %v582_v30 = vmax.f32 %v581_v23, %v1646_v13  ;;  %v602_v22 = vmax.f32 %v601_v47, %v1640_v10  ;;  %v623_v23 = vmax.f32 %v622_v14, %v1642_v11 }
 0x10a   : > { %v1654_v18 = vpop.f32.mrf.mxu2  ;;  %v1656_v19 = vpop.f32.mrf.mxu3 }
 0x10b   : > { %v1658_v20 = vpop.f32.mrf.mxu0  ;;  %v1660_v21 = vpop.f32.mrf.mxu1  ;;  %v624_v31 = vmax.f32 %v623_v23, %v1656_v19 }
 0x10c   : > { %v562_v38 = vmax.f32 %v561_v34, %v1658_v20  ;;  %v583_v42 = vmax.f32 %v582_v30, %v1660_v21  ;;  %v603_v30 = vmax.f32 %v602_v22, %v1654_v18 }
 0x112   : > { %v1676_v16 = vpop.f32.mrf.mxu2  ;;  %v1678_v17 = vpop.f32.mrf.mxu3 }
 0x113   : > { %v1682_v35 = vpop.f32.mrf.mxu0  ;;  %v1684_v24 = vpop.f32.mrf.mxu1  ;;  %v625_v47 = vmax.f32 %v624_v31, %v1678_v17 }
 0x114   : > { %v563_v15 = vmax.f32 %v562_v38, %v1682_v35  ;;  %v584_v46 = vmax.f32 %v583_v42, %v1684_v24  ;;  %v604_v42 = vmax.f32 %v603_v30, %v1676_v16 }
 0x11a   : > { %v1700_v43 = vpop.f32.mrf.mxu2  ;;  %v1702_v25 = vpop.f32.mrf.mxu3 }
 0x11b   : > { %v350_v28 = vpop.f32.mrf.mxu0  ;;  %v1706_v29 = vpop.f32.mrf.mxu1  ;;  %v626_v50 = vmax.f32 %v625_v47, %v1702_v25 }
 0x11c   : > { %v564_v33 = vmax.f32 %v563_v15, %v350_v28  ;;  %v585_v26 = vmax.f32 %v584_v46, %v1706_v29  ;;  %v605_v46 = vmax.f32 %v604_v42, %v1700_v43 }
 0x122   : > { %v1721_v27 = vpop.f32.mrf.mxu2  ;;  %v1723_v34 = vpop.f32.mrf.mxu3 }
 0x123   : > { %v353_v39 = vpop.f32.mrf.mxu0  ;;  %v418_v32 = vpop.f32.mrf.mxu1  ;;  %v606_v22 = vmax.f32 %v605_v46, %v1721_v27  ;;  %v627_v23 = vmax.f32 %v626_v50, %v1723_v34 }
 0x124   : > { %v565_v38 = vmax.f32 %v564_v33, %v353_v39  ;;  %v586_v51 = vmax.f32 %v585_v26, %v418_v32 }
 0x126   : > { %v566_v14 = vrot.slane %v565_v38, 4  ;;  %v587_v15 = vrot.slane %v586_v51, 4 }
 0x128   : > { %v567_v37 = vmax.f32 %v565_v38, %v566_v14  ;;  %v588_v36 = vmax.f32 %v586_v51, %v587_v15 }
 0x12a   : > { %v568_v55 = vrot.slane %v567_v37, 2  ;;  %v589_v54 = vrot.slane %v588_v36, 2  ;;  %v483_v33 = vpop.f32.mrf.mxu2  ;;  %v548_v26 = vpop.f32.mrf.mxu3 }
 0x12b   : > { %v607_v41 = vmax.f32 %v606_v22, %v483_v33  ;;  %v628_v30 = vmax.f32 %v627_v23, %v548_v26 }
 0x12c   : > { %v569_v40 = vmax.f32 %v567_v37, %v568_v55  ;;  %v590_v31 = vmax.f32 %v588_v36, %v589_v54 }
 0x12d   : > { %v608_v59 = vrot.slane %v607_v41, 4  ;;  %v629_v58 = vrot.slane %v628_v30, 4 }
 0x12e   : > { %v570_v45 = vrot.slane %v569_v40, 1  ;;  %v591_v42 = vrot.slane %v590_v31, 1 }
 0x12f   : > { %v609_v44 = vmax.f32 %v607_v41, %v608_v59  ;;  %v630_v47 = vmax.f32 %v628_v30, %v629_v58 }
 0x130   : > { %v1733_v38 = vmax.f32 %v569_v40, %v570_v45  ;;  %v1735_v51 = vmax.f32 %v590_v31, %v591_v42 }
 0x131   : > { %v610_v14 = vrot.slane %v609_v44, 2  ;;  %v631_v50 = vrot.slane %v630_v47, 2 }
 0x132   : > { %v695_v15 = vsub.f32 %v353_v39, %v1733_v38  ;;  %v696_v46 = vsub.f32 %v418_v32, %v1735_v51  ;;  %v691_v22 = vsub.f32 %v350_v28, %v1733_v38  ;;  %v692_v36 = vsub.f32 %v1706_v29, %v1735_v51 }
 0x133   : > { %v611_v37 = vmax.f32 %v609_v44, %v610_v14  ;;  %v632_v54 = vmax.f32 %v630_v47, %v631_v50  ;;  %v687_v41 = vsub.f32 %v1682_v35, %v1733_v38  ;;  %v688_v40 = vsub.f32 %v1684_v24, %v1735_v51 }
 0x134   : > { %v819_v45 = vmul.f32 1.442695, %v695_v15  ;;  %v821_v55 = vmul.f32 1.442695, %v696_v46  ;;  %v811_v58 = vmul.f32 1.442695, %v691_v22  ;;  %v683_v59 = vsub.f32 %v1658_v20, %v1733_v38 }
 0x135   : > { %v612_v32 = vrot.slane %v611_v37, 1  ;;  %v633_v39 = vrot.slane %v632_v54, 1  ;;  %v813_v28 = vmul.f32 1.442695, %v692_v36  ;;  %v803_v23 = vmul.f32 1.442695, %v687_v41 }
 0x136   : > { %1160 = vpow2.f32 %v819_v45  ;;  %v684_v44 = vsub.f32 %v1660_v21, %v1735_v51  ;;  %v805_v24 = vmul.f32 1.442695, %v688_v40  ;;  %v795_v30 = vmul.f32 1.442695, %v683_v59 }
 0x137   : > { %1162 = vpow2.f32 %v821_v55  ;;  %v1750_v29 = vmax.f32 %v611_v37, %v612_v32  ;;  %v1752_v35 = vmax.f32 %v632_v54, %v633_v39  ;;  %v679_v31 = vsub.f32 %v1644_v12, %v1733_v38 }
 0x138   : > { %1164 = vpow2.f32 %v811_v58  ;;  %v680_v47 = vsub.f32 %v1646_v13, %v1735_v51  ;;  %v797_v21 = vmul.f32 1.442695, %v684_v44  ;;  %v676_v36 = vsub.f32 %v1638_v9, %v1735_v51 }
 0x139   : > { %v697_v20 = vsub.f32 %v483_v33, %v1750_v29  ;;  %v698_v42 = vsub.f32 %v548_v26, %v1752_v35  ;;  %1166 = vpow2.f32 %v813_v28  ;;  %v693_v14 = vsub.f32 %v1721_v27, %v1750_v29 }
 0x13a   : > { %1168 = vpow2.f32 %v803_v23  ;;  %v694_v46 = vsub.f32 %v1723_v34, %v1752_v35  ;;  %v787_v33 = vmul.f32 1.442695, %v679_v31  ;;  %v675_v26 = vsub.f32 %v1636_v8, %v1733_v38 }
 0x13b   : > { %v823_v50 = vmul.f32 1.442695, %v697_v20  ;;  %v825_v15 = vmul.f32 1.442695, %v698_v42  ;;  %1170 = vpow2.f32 %v805_v24  ;;  %v789_v13 = vmul.f32 1.442695, %v680_v47 }
 0x13c   : > { %v1161_v12 = vpop.eup %1160  ;;  %1172 = vpow2.f32 %v795_v30  ;;  %v815_v37 = vmul.f32 1.442695, %v693_v14  ;;  %v689_v34 = vsub.f32 %v1700_v43, %v1750_v29  ;;  %v817_v41 = vmul.f32 1.442695, %v694_v46 }
 0x13d   : > { %v1163_v22 = vpop.eup %1162  ;;  %1174 = vpow2.f32 %v823_v50  ;;  %828 = vmatpush.msrb.mxu0 %v1161_v12  ;;  %v690_v8 = vsub.f32 %v1702_v25, %v1752_v35  ;;  %v779_v45 = vmul.f32 1.442695, %v675_v26  ;;  %v671_v9 = vsub.f32 %v1628_v4, %v1733_v38 }
 0x13e   : > { %v1165_v27 = vpop.eup %1164  ;;  %1176 = vpow2.f32 %v825_v15  ;;  %848 = vmatpush.msrb.mxu1 %v1163_v22  ;;  %v781_v58 = vmul.f32 1.442695, %v676_v36  ;;  %v672_v43 = vsub.f32 %v1630_v5, %v1735_v51  ;;  %v807_v32 = vmul.f32 1.442695, %v689_v34 }
 0x13f   : > { %v1167_v54 = vpop.eup %1166  ;;  %829 = vmatpush.msrb.mxu0 %v1165_v27  ;;  %1178 = vpow2.f32 %v797_v21  ;;  %v685_v25 = vsub.f32 %v1676_v16, %v1750_v29  ;;  %v809_v28 = vmul.f32 1.442695, %v690_v8  ;;  %v686_v4 = vsub.f32 %v1678_v17, %v1752_v35 }
 0x140   : > { %v1169_v40 = vpop.eup %1168  ;;  %849 = vmatpush.msrb.mxu1 %v1167_v54  ;;  %1180 = vpow2.f32 %v787_v33  ;;  %v771_v44 = vmul.f32 1.442695, %v671_v9  ;;  %v667_v5 = vsub.f32 %v1620_v0, %v1733_v38  ;;  %v773_v30 = vmul.f32 1.442695, %v672_v43 }
 0x141   : > { %v1171_v55 = vpop.eup %1170  ;;  %830 = vmatpush.msrb.mxu0 %v1169_v40  ;;  %1182 = vpow2.f32 %v789_v13  ;;  %v668_v16 = vsub.f32 %v1622_v1, %v1735_v51  ;;  %v799_v20 = vmul.f32 1.442695, %v685_v25  ;;  %v681_v17 = vsub.f32 %v1654_v18, %v1750_v29 }
 0x142   : > { %v1173_v59 = vpop.eup %1172  ;;  %850 = vmatpush.msrb.mxu1 %v1171_v55  ;;  %1184 = vpow2.f32 %v815_v37  ;;  %v801_v47 = vmul.f32 1.442695, %v686_v4  ;;  %v682_v0 = vsub.f32 %v1656_v19, %v1752_v35  ;;  %v763_v14 = vmul.f32 1.442695, %v667_v5 }
 0x143   : > { %v1175_v39 = vpop.eup %1174  ;;  %831 = vmatpush.msrb.mxu0 %v1173_v59  ;;  %1186 = vpow2.f32 %v817_v41  ;;  %v663_v1 = vsub.f32 %v1612_v60, %v1733_v38  ;;  %v765_v15 = vmul.f32 1.442695, %v668_v16  ;;  %v664_v18 = vsub.f32 %v1614_v61, %v1735_v51 }
 0x144   : > { %v1177_v23 = vpop.eup %1176  ;;  %868 = vmatpush.msrb.mxu2 %v1175_v39  ;;  %1188 = vpow2.f32 %v779_v45  ;;  %v791_v12 = vmul.f32 1.442695, %v681_v17  ;;  %v677_v19 = vsub.f32 %v1640_v10, %v1750_v29  ;;  %v793_v26 = vmul.f32 1.442695, %v682_v0 }
 0x145   : > { %v1179_v24 = vpop.eup %1178  ;;  %888 = vmatpush.msrb.mxu3 %v1177_v23  ;;  %1190 = vpow2.f32 %v781_v58  ;;  %v678_v60 = vsub.f32 %v1642_v11, %v1752_v35  ;;  %v755_v13 = vmul.f32 1.442695, %v663_v1  ;;  %v659_v61 = vsub.f32 %v1604_v56, %v1733_v38  ;;  %v1956_v1 = vld [vmem:[#allocation27_spill] sm:$0xff] }
 0x146   : > { %v1181_v31 = vpop.eup %1180  ;;  %851 = vmatpush.msrb.mxu1 %v1179_v24  ;;  %1192 = vpow2.f32 %v807_v32  ;;  %v757_v27 = vmul.f32 1.442695, %v664_v18  ;;  %v660_v10 = vsub.f32 %v1606_v57, %v1735_v51  ;;  %v783_v34 = vmul.f32 1.442695, %v677_v19 }
 0x147   : > { %v1183_v42 = vpop.eup %1182  ;;  %832 = vmatpush.msrb.mxu0 %v1181_v31  ;;  %1194 = vpow2.f32 %v809_v28  ;;  %v673_v11 = vsub.f32 %v1632_v6, %v1750_v29  ;;  %v785_v41 = vmul.f32 1.442695, %v678_v60  ;;  %v674_v56 = vsub.f32 %v1634_v7, %v1752_v35 }
 0x148   : > { %v1185_v21 = vpop.eup %1184  ;;  %852 = vmatpush.msrb.mxu1 %v1183_v42  ;;  %1196 = vpow2.f32 %v771_v44  ;;  %v747_v40 = vmul.f32 1.442695, %v659_v61  ;;  %v655_v57 = vsub.f32 %v1596_v52, %v1733_v38  ;;  %v749_v9 = vmul.f32 1.442695, %v660_v10  ;;  %v1959_v61 = vld [vmem:[#allocation24_spill] sm:$0xff] }
 0x149   : > { %v1187_v50 = vpop.eup %1186  ;;  %869 = vmatpush.msrb.mxu2 %v1185_v21  ;;  %1198 = vpow2.f32 %v773_v30  ;;  %v656_v6 = vsub.f32 %v1598_v53, %v1735_v51  ;;  %v775_v58 = vmul.f32 1.442695, %v673_v11  ;;  %v669_v7 = vsub.f32 %v1624_v2, %v1750_v29 }
 0x14a   : > { %v1189_v46 = vpop.eup %1188  ;;  %889 = vmatpush.msrb.mxu3 %v1187_v50  ;;  %1200 = vpow2.f32 %v799_v20  ;;  %v777_v59 = vmul.f32 1.442695, %v674_v56  ;;  %v670_v52 = vsub.f32 %v1626_v3, %v1752_v35  ;;  %v739_v25 = vmul.f32 1.442695, %v655_v57  ;;  %v1962_v57 = vld [vmem:[#allocation11_spill] sm:$0xff] }
 0x14b   : > { %v1191_v33 = vpop.eup %1190  ;;  %833 = vmatpush.msrb.mxu0 %v1189_v46  ;;  %1202 = vpow2.f32 %v801_v47  ;;  %v651_v53 = vsub.f32 %v1588_v48, %v1733_v38  ;;  %v741_v28 = vmul.f32 1.442695, %v656_v6  ;;  %v652_v2 = vsub.f32 %v1590_v49, %v1735_v51  ;;  %v1953_v49 = vld [vmem:[#allocation18_spill] sm:$0xff] }
 0x14c   : > { %v1193_v22 = vpop.eup %1192  ;;  %853 = vmatpush.msrb.mxu1 %v1191_v33  ;;  %1204 = vpow2.f32 %v763_v14  ;;  %v767_v23 = vmul.f32 1.442695, %v669_v7  ;;  %v665_v3 = vsub.f32 %v1616_v62, %v1750_v29  ;;  %v769_v5 = vmul.f32 1.442695, %v670_v52  ;;  %v1954_v62 = vld [vmem:[#allocation19_spill] sm:$0xff]  ;;  %v1957_v46 = vld [vmem:[#allocation14_spill] sm:$0xff] }
 0x14d   : > { %v1195_v36 = vpop.eup %1194  ;;  %870 = vmatpush.msrb.mxu2 %v1193_v22  ;;  %1206 = vpow2.f32 %v765_v15  ;;  %v666_v48 = vsub.f32 %v1618_v63, %v1752_v35  ;;  %v731_v30 = vmul.f32 1.442695, %v651_v53  ;;  %v647_v16 = vsub.f32 %v1953_v49, %v1733_v38  ;;  %v1955_v63 = vld [vmem:[#allocation26_spill] sm:$0xff] }
 0x14e   : > { %v1197_v37 = vpop.eup %1196  ;;  %890 = vmatpush.msrb.mxu3 %v1195_v36  ;;  %1208 = vpow2.f32 %v791_v12  ;;  %v733_v20 = vmul.f32 1.442695, %v652_v2  ;;  %v648_v17 = vsub.f32 %v1954_v62, %v1735_v51  ;;  %v759_v47 = vmul.f32 1.442695, %v665_v3  ;;  %v1965_v53 = vld [vmem:[#allocation6_spill] sm:$0xff] }
 0x14f   : > { %v1199_v54 = vpop.eup %1198  ;;  %834 = vmatpush.msrb.mxu0 %v1197_v37  ;;  %1210 = vpow2.f32 %v793_v26  ;;  %v661_v0 = vsub.f32 %v1955_v63, %v1750_v29  ;;  %v761_v14 = vmul.f32 1.442695, %v666_v48  ;;  %v662_v50 = vsub.f32 %v1956_v1, %v1752_v35  ;;  %v1958_v26 = vld [vmem:[#allocation15_spill] sm:$0xff]  ;;  %v1960_v37 = vld [vmem:[#allocation25_spill] sm:$0xff] }
 0x150   : > { %v1201_v8 = vpop.eup %1200  ;;  %854 = vmatpush.msrb.mxu1 %v1199_v54  ;;  %1212 = vpow2.f32 %v755_v13  ;;  %v723_v18 = vmul.f32 1.442695, %v647_v16  ;;  %v643_v12 = vsub.f32 %v1957_v46, %v1733_v38  ;;  %v725_v33 = vmul.f32 1.442695, %v648_v17 }
 0x151   : > { %v1203_v45 = vpop.eup %1202  ;;  %871 = vmatpush.msrb.mxu2 %v1201_v8  ;;  %1214 = vpow2.f32 %v757_v27  ;;  %v644_v60 = vsub.f32 %v1958_v26, %v1735_v51  ;;  %v751_v13 = vmul.f32 1.442695, %v661_v0  ;;  %v657_v36 = vsub.f32 %v1959_v61, %v1750_v29 }
 0x152   : > { %v1205_v55 = vpop.eup %1204  ;;  %891 = vmatpush.msrb.mxu3 %v1203_v45  ;;  %1216 = vpow2.f32 %v783_v34  ;;  %v753_v10 = vmul.f32 1.442695, %v662_v50  ;;  %v658_v34 = vsub.f32 %v1960_v37, %v1752_v35  ;;  %v715_v54 = vmul.f32 1.442695, %v643_v12 }
 0x153   : > { %v1207_v43 = vpop.eup %1206  ;;  %835 = vmatpush.msrb.mxu0 %v1205_v55  ;;  %1218 = vpow2.f32 %v785_v41  ;;  %v1961_v41 = vld [vmem:[#allocation10_spill] sm:$0xff]  ;;  %v640_v45 = vsub.f32 %v1962_v57, %v1735_v51  ;;  %v743_v6 = vmul.f32 1.442695, %v657_v36 }
 0x154   : > { %v1209_v32 = vpop.eup %1208  ;;  %855 = vmatpush.msrb.mxu1 %v1207_v43  ;;  %1220 = vpow2.f32 %v747_v40  ;;  %v639_v56 = vsub.f32 %v1961_v41, %v1733_v38  ;;  %v717_v40 = vmul.f32 1.442695, %v644_v60  ;;  %v1963_v55 = vld [vmem:[#allocation22_spill] sm:$0xff]  ;;  %v745_v43 = vmul.f32 1.442695, %v658_v34 }
 0x155   : > { %v1211_v39 = vpop.eup %1210  ;;  %872 = vmatpush.msrb.mxu2 %v1209_v32  ;;  %1222 = vpow2.f32 %v749_v9  ;;  %v709_v2 = vmul.f32 1.442695, %v640_v45 }
 0x156   : > { %v1213_v4 = vpop.eup %1212  ;;  %892 = vmatpush.msrb.mxu3 %v1211_v39  ;;  %1224 = vpow2.f32 %v775_v58  ;;  %v653_v58 = vsub.f32 %v1963_v55, %v1750_v29  ;;  %v635_v39 = vsub.f32 %v1965_v53, %v1733_v38  ;;  %v1968_v38 = vld [vmem:[#allocation21_spill] sm:$0xff] }
 0x157   : > { %v1215_v44 = vpop.eup %1214  ;;  %836 = vmatpush.msrb.mxu0 %v1213_v4  ;;  %1226 = vpow2.f32 %v777_v59  ;;  %v1964_v59 = vld [vmem:[#allocation23_spill] sm:$0xff]  ;;  %v650_v49 = vsub.f32 %v1968_v38, %v1752_v35 }
 0x158   : > { %v1217_v24 = vpop.eup %1216  ;;  %856 = vmatpush.msrb.mxu1 %v1215_v44  ;;  %1228 = vpow2.f32 %v739_v25  ;;  %v654_v52 = vsub.f32 %v1964_v59, %v1752_v35  ;;  %v707_v25 = vmul.f32 1.442695, %v639_v56  ;;  %v1966_v4 = vld [vmem:[#allocation7_spill] sm:$0xff]  ;;  %v735_v44 = vmul.f32 1.442695, %v653_v58 }
 0x159   : > { %v1219_v31 = vpop.eup %1218  ;;  %873 = vmatpush.msrb.mxu2 %v1217_v24  ;;  %1230 = vpow2.f32 %v741_v28  ;;  %v729_v50 = vmul.f32 1.442695, %v650_v49 }
 0x15a   : > { %v1221_v42 = vpop.eup %1220  ;;  %893 = vmatpush.msrb.mxu3 %v1219_v31  ;;  %1232 = vpow2.f32 %v767_v23  ;;  %v636_v23 = vsub.f32 %v1966_v4, %v1735_v51  ;;  %v699_v31 = vmul.f32 1.442695, %v635_v39  ;;  %v1969_v51 = vld [vmem:[#allocation16_spill] sm:$0xff] }
 0x15b   : > { %v1223_v21 = vpop.eup %1222  ;;  %837 = vmatpush.msrb.mxu0 %v1221_v42  ;;  %1234 = vpow2.f32 %v769_v5  ;;  %v1967_v5 = vld [vmem:[#allocation20_spill] sm:$0xff]  ;;  %v1970_v42 = vld [vmem:[#allocation17_spill] sm:$0xff] }
 0x15c   : > { %v1225_v15 = vpop.eup %1224  ;;  %857 = vmatpush.msrb.mxu1 %v1223_v21  ;;  %1236 = vpow2.f32 %v731_v30  ;;  %v649_v48 = vsub.f32 %v1967_v5, %v1750_v29  ;;  %v737_v30 = vmul.f32 1.442695, %v654_v52  ;;  %v701_v17 = vmul.f32 1.442695, %v636_v23  ;;  %v1971_v21 = vld [vmem:[#allocation12_spill] sm:$0xff] }
 0x15d   : > { %v1227_v19 = vpop.eup %1226  ;;  %874 = vmatpush.msrb.mxu2 %v1225_v15  ;;  %1238 = vpow2.f32 %v733_v20  ;;  %v645_v20 = vsub.f32 %v1969_v51, %v1750_v29  ;;  %v1972_v15 = vld [vmem:[#allocation13_spill] sm:$0xff] }
 0x15e   : > { %v1229_v22 = vpop.eup %1228  ;;  %894 = vmatpush.msrb.mxu3 %v1227_v19  ;;  %1240 = vpow2.f32 %v759_v47  ;;  %v646_v47 = vsub.f32 %v1970_v42, %v1752_v35  ;;  %v727_v0 = vmul.f32 1.442695, %v649_v48  ;;  %v1973_v19 = vld [vmem:[#allocation8_spill] sm:$0xff] }
 0x15f   : > { %v1231_v27 = vpop.eup %1230  ;;  %838 = vmatpush.msrb.mxu0 %v1229_v22  ;;  %1242 = vpow2.f32 %v761_v14  ;;  %v641_v14 = vsub.f32 %v1971_v21, %v1750_v29  ;;  %v719_v12 = vmul.f32 1.442695, %v645_v20  ;;  %v1974_v22 = vld [vmem:[#allocation9_spill] sm:$0xff] }
 0x160   : > { %v1233_v11 = vpop.eup %1232  ;;  %858 = vmatpush.msrb.mxu1 %v1231_v27  ;;  %1244 = vpow2.f32 %v723_v18  ;;  %v642_v18 = vsub.f32 %v1972_v15, %v1752_v35  ;;  %v721_v60 = vmul.f32 1.442695, %v646_v47 }
 0x161   : > { %v1235_v8 = vpop.eup %1234  ;;  %875 = vmatpush.msrb.mxu2 %v1233_v11  ;;  %1246 = vpow2.f32 %v725_v33  ;;  %v637_v33 = vsub.f32 %v1973_v19, %v1750_v29  ;;  %v711_v36 = vmul.f32 1.442695, %v641_v14 }
 0x162   : > { %v1237_v9 = vpop.eup %1236  ;;  %895 = vmatpush.msrb.mxu3 %v1235_v8  ;;  %1248 = vpow2.f32 %v751_v13  ;;  %v638_v13 = vsub.f32 %v1974_v22, %v1752_v35  ;;  %v827_v35 = vld [vmem:[%s1905_s2] sm:$0x3] }
 0x163   : > { %v1239_v7 = vpop.eup %1238  ;;  %839 = vmatpush.msrb.mxu0 %v1237_v9  ;;  %1250 = vpow2.f32 %v753_v10  ;;  %v713_v10 = vmul.f32 1.442695, %v642_v18  ;;  %v703_v34 = vmul.f32 1.442695, %v637_v33 }
 0x164   : > { %v1241_v32 = vpop.eup %1240  ;;  %859 = vmatpush.msrb.mxu1 %v1239_v7  ;;  %1252 = vpow2.f32 %v715_v54  ;;  %v705_v11 = vmul.f32 1.442695, %v638_v13 }
 0x165   : > { %v1243_v28 = vpop.eup %1242  ;;  %876 = vmatpush.msrb.mxu2 %v1241_v32  ;;  %1254 = vpow2.f32 %v717_v40 }
 0x166   : > { %v1245_v3 = vpop.eup %1244  ;;  %896 = vmatpush.msrb.mxu3 %v1243_v28  ;;  %1256 = vpow2.f32 %v743_v6 }
 0x167   : > { %v1247_v24 = vpop.eup %1246  ;;  %840 = vmatpush.msrb.mxu0 %v1245_v3  ;;  %1258 = vpow2.f32 %v745_v43 }
 0x168   : > { %v1249_v16 = vpop.eup %1248  ;;  %860 = vmatpush.msrb.mxu1 %v1247_v24  ;;  %1260 = vpow2.f32 %v707_v25 }
 0x169   : > { %v1251_v62 = vpop.eup %1250  ;;  %877 = vmatpush.msrb.mxu2 %v1249_v16  ;;  %1262 = vpow2.f32 %v709_v2 }
 0x16a   : > { %v1253_v63 = vpop.eup %1252  ;;  %897 = vmatpush.msrb.mxu3 %v1251_v62  ;;  %1264 = vpow2.f32 %v735_v44 }
 0x16b   : > { %v1255_v1 = vpop.eup %1254  ;;  %841 = vmatpush.msrb.mxu0 %v1253_v63  ;;  %1266 = vpow2.f32 %v737_v30 }
 0x16c   : > { %v1257_v46 = vpop.eup %1256  ;;  %861 = vmatpush.msrb.mxu1 %v1255_v1  ;;  %1268 = vpow2.f32 %v699_v31 }
 0x16d   : > { %v1259_v26 = vpop.eup %1258  ;;  %878 = vmatpush.msrb.mxu2 %v1257_v46  ;;  %1270 = vpow2.f32 %v701_v17  ;;  %v953_v17 = vlaneseq }
 0x16e   : > { %v1261_v61 = vpop.eup %1260  ;;  %898 = vmatpush.msrb.mxu3 %v1259_v26  ;;  %1272 = vpow2.f32 %v727_v0 }
 0x16f   : > { %v1263_v27 = vpop.eup %1262  ;;  %842 = vmatpush.msrb.mxu0 %v1261_v61  ;;  %1274 = vpow2.f32 %v729_v50  ;;  %vm955_vm4 = vcmp.lt.s32.totalorder %v953_v17, 512 }
 0x170   : > { %v1265_v37 = vpop.eup %1264  ;;  %862 = vmatpush.msrb.mxu1 %v1263_v27  ;;  %1276 = vpow2.f32 %v719_v12 }
 0x171   : > { %v1267_v29 = vpop.eup %1266  ;;  %879 = vmatpush.msrb.mxu2 %v1265_v37  ;;  %1278 = vpow2.f32 %v721_v60 }
 0x172   : > { %v1269_v54 = vpop.eup %1268  ;;  %899 = vmatpush.msrb.mxu3 %v1267_v29  ;;  %1280 = vpow2.f32 %v711_v36 }
 0x173   : > { %v1271_v41 = vpop.eup %1270  ;;  %843 = vmatpush.msrb.mxu0 %v1269_v54  ;;  %1282 = vpow2.f32 %v713_v10 }
 0x174   : > { %v1273_v56 = vpop.eup %1272  ;;  %863 = vmatpush.msrb.mxu1 %v1271_v41  ;;  %1284 = vpow2.f32 %v703_v34  ;;  %844 = vmatmul.f32.vlgmr.msrb.gmra.mxu0 %v827_v35 }
 0x175   : > { %v1275_v8 = vpop.eup %1274  ;;  %880 = vmatpush.msrb.mxu2 %v1273_v56  ;;  %1286 = vpow2.f32 %v705_v11  ;;  %864 = vmatmul.f32.vlgmr.msrb.gmra.mxu1 %v827_v35 }
 0x176   : > { %v1277_v40 = vpop.eup %1276  ;;  %900 = vmatpush.msrb.mxu3 %v1275_v8 }
 0x177   : > { %v1279_v57 = vpop.eup %1278  ;;  %881 = vmatpush.msrb.mxu2 %v1277_v40 }
 0x178   : > { %v1281_v45 = vpop.eup %1280  ;;  %901 = vmatpush.msrb.mxu3 %v1279_v57 }
 0x179   : > { %v1283_v9 = vpop.eup %1282  ;;  %882 = vmatpush.msrb.mxu2 %v1281_v45 }
 0x17a   : > { %v1285_v6 = vpop.eup %1284  ;;  %902 = vmatpush.msrb.mxu3 %v1283_v9 }
 0x17b   : > { %v1287_v55 = vpop.eup %1286  ;;  %883 = vmatpush.msrb.mxu2 %v1285_v6 }
 0x17c   : > { %903 = vmatpush.msrb.mxu3 %v1287_v55  ;;  %884 = vmatmul.f32.vlgmr.msrb.gmra.mxu2 %v827_v35 }
 0x17d   : > { %904 = vmatmul.f32.vlgmr.msrb.gmra.mxu3 %v827_v35 }
 0x1f1   : > { %v845_v7 = vpop.f32.mrf.mxu0 }
 0x1f2   : > { %v865_v58 = vpop.f32.mrf.mxu1 }
 0x1f3   : > { %1288 = vrcp.f32 %v865_v58 }
 0x1f4   : > { %1290 = vrcp.f32 %v845_v7 }
 0x1f9   : > { %v1289_v43 = vpop.eup %1288 }
 0x1fa   : > { %v913_v59 = vmul.f32 %v1289_v43, %v865_v58  ;;  %v1291_v52 = vpop.eup %1290 }
 0x1fb   : > { %v912_v39 = vmul.f32 %v1291_v52, %v845_v7 }
 0x1fc   : > { %v917_v25 = vsub.f32 2.0, %v913_v59 }
 0x1fd   : > { %v916_v4 = vsub.f32 2.0, %v912_v39 }
 0x1fe   : > { %v921_v28 = vmul.f32 %v1289_v43, %v917_v25 }
 0x1ff   : > { %v885_v32 = vpop.f32.mrf.mxu2  ;;  %v920_v30 = vmul.f32 %v1291_v52, %v916_v4 }
 0x200   : > { %1292 = vrcp.f32 %v885_v32  ;;  %v905_v53 = vpop.f32.mrf.mxu3  ;;  %v929_v44 = vrot.slane %v921_v28, 1 }
 0x201   : > { %1294 = vrcp.f32 %v905_v53  ;;  %v928_v20 = vrot.slane %v920_v30, 1 }
 0x202   : > { %v937_v49 = vmul.f32 %v929_v44, %v865_v58 }
 0x203   : > { %v936_v21 = vmul.f32 %v928_v20, %v845_v7 }
 0x204   : > { %v944_v42 = vrot.slane %v937_v49, 7 }
 0x206   : > { %v1293_v2 = vpop.eup %1292  ;;  %v947_v1 = vsel %vm278_vm0, %v936_v21, %v944_v42 }
 0x207   : > { %v1295_v23 = vpop.eup %1294  ;;  %v914_v3 = vmul.f32 %v1293_v2, %v885_v32 }
 0x208   : > { %v915_v5 = vmul.f32 %v1295_v23, %v905_v53 }
 0x209   : > { %v918_v48 = vsub.f32 2.0, %v914_v3 }
 0x20a   : > { %v919_v24 = vsub.f32 2.0, %v915_v5 }
 0x20b   : > { %v922_v38 = vmul.f32 %v1293_v2, %v918_v48 }
 0x20c   : > { %v923_v16 = vmul.f32 %v1295_v23, %v919_v24 }
 0x20d   : > { %v930_v31 = vrot.slane %v922_v38, 1 }
 0x20e   : > { %v931_v51 = vrot.slane %v923_v16, 1 }
 0x20f   : > { %v938_v62 = vmul.f32 %v930_v31, %v885_v32 }
 0x210   : > { %v939_v47 = vmul.f32 %v931_v51, %v905_v53 }
 0x211   : > { %v945_v63 = vrot.slane %v938_v62, 6 }
 0x212   : > { %v946_v0 = vrot.slane %v939_v47, 5 }
 0x214   : > { %v949_v14 = vsel %vm948_vm2, %v945_v63, %v946_v0 }
 0x215   : > { %v951_v50 = vsel %vm950_vm3, %v947_v1, %v949_v14 }
 0x216   : > { %957 = vst.msk [vmem:[%s202_s17] sm:$0xf] %vm955_vm4, %v951_v50 }
 0x217   : > { %1323 = shalt.err (!%p1320_p5)
}
 0x218   : > { %1121 = dma.vmem_to_hbm [thread:$0]  (%p1418_p6), %s972_s19, 64, %s974_s20, %s959_s16  }
 0x219 PF: > { %s985_s4 = sand.u32 1, %s1346_s12   ;;  %p1124_p7 = pnand %p1041_p9, %p1422_p8 }
 0x21a   : > { %s986_s5 = scalar_lea.sflag [#allocation4], %s985_s4 }
 0x21b   : > { %p1125_p10 = pneg %p1124_p7 }
 0x21d   : > { %1341 = dma.done.wait (%p1125_p10), %s986_s5, 64  }
 0x21e   : > { %1343 = vsyncadd (%p1125_p10), %s986_s5, 4294967232  ;;  %p13_p11 = scmp.ge.s32.totalorder %s1403_s18, 4   ;;  %s1975_s12 = smov %s1350_s13 }
 0x21f   : > { %s1976_s13 = smov %s1354_s14  ;;  %s1977_s14 = smov %s1416_s21 }
 0x220   : > { %s1978_s15 = smov %s1403_s18  ;;  %15 = sbr.rel (!%p13_p11) target bundleno = 3 (0x3), region = 95 }
 0x225   :  { %992 = vsyncpa [#allocation4], 1 }
 0x226   :  { %994 = vsyncpa [#allocation4 + $0x1], 1 }

</bundles_post_ra>
